<compile_context>
chip_gen: v7x
topology: tpu7x:2x2x1
jax: 0.10.0
libtpu: 0.0.40
codegen_flags: <defaults>
</compile_context>

<pallas_src>
import math

import numpy as np
import jax
import jax.numpy as jnp
from jax.experimental import pallas as pl
from jax.experimental.pallas import tpu as pltpu


def _round_up(x, m):
    return -(-x // m) * m


def _pick_tile(n, candidates=(512, 256, 128, 64, 32, 16, 8)):
    """Largest tile from `candidates` that divides n (n is a multiple of 8)."""
    for t in candidates:
        if n % t == 0:
            return t
    return n


# --------------------------------------------------------------------------
# Analytic bases (norm='ortho').  Total transform equals
#   out[zd,zh,zw] = (1/sqrt(nd*nh*nw)) * sum_{kd,kh,kw} c_kw *
#                   Re{ X[kd,kh,kw] * exp(2*pi*i*(kd*zd/nd + kh*zh/nh + kw*zw/nw)) }
# with c_kw = 1 for kw == 0 and (nw even and kw == nw//2), else 2.
# --------------------------------------------------------------------------
def _build_dh_basis(nd, nh, ndh_p, dtype=jnp.bfloat16):
    """Combined inverse 2D DFT basis over (d, h) for LEFT-multiplication.

    Returns CdhT, SdhT of shape (ndh_p, nd*nh).  Row index is the flattened
    output position z = zd*nh + zh, column index the flattened mode
    k = kd*nh + kh.  Rows >= nd*nh are zero padding (sliced off later).
    """
    kd = np.arange(nd, dtype=np.float64).reshape(nd, 1, 1, 1)
    kh = np.arange(nh, dtype=np.float64).reshape(1, nh, 1, 1)
    zd = np.arange(nd, dtype=np.float64).reshape(1, 1, nd, 1)
    zh = np.arange(nh, dtype=np.float64).reshape(1, 1, 1, nh)
    phase = 2.0 * np.pi * (kd * zd / nd + kh * zh / nh)
    scale = 1.0 / math.sqrt(nd * nh)
    ndh = nd * nh
    cdh_t = (scale * np.cos(phase)).reshape(ndh, ndh).T   # (z, k)
    sdh_t = (scale * np.sin(phase)).reshape(ndh, ndh).T   # (z, k)
    if ndh_p != ndh:
        pad = ((0, ndh_p - ndh), (0, 0))
        cdh_t = np.pad(cdh_t, pad)
        sdh_t = np.pad(sdh_t, pad)
    return jnp.asarray(cdh_t, dtype=dtype), jnp.asarray(sdh_t, dtype=dtype)


def _build_w_basis(nw, nwh_p, nw_p, dtype=jnp.bfloat16):
    """Real inverse DFT basis along w for RIGHT-multiplication: (nwh_p, nw_p).

    Cw multiplies Re(Y), Sw multiplies Im(Y).  Rows >= nw//2+1 and columns
    >= nw are zero padding (the corresponding spectrum columns are zero too).
    """
    nwh = nw // 2 + 1
    kw = np.arange(nwh, dtype=np.float64).reshape(nwh, 1)
    zw = np.arange(nw, dtype=np.float64).reshape(1, nw)
    theta = 2.0 * np.pi * kw * zw / nw
    c_kw = np.full((nwh, 1), 2.0)
    c_kw[0, 0] = 1.0
    if nw % 2 == 0:
        c_kw[-1, 0] = 1.0
    scale = 1.0 / math.sqrt(nw)
    cw = c_kw * scale * np.cos(theta)        # multiplies Re(Y)
    sw = -c_kw * scale * np.sin(theta)       # multiplies Im(Y)
    pad = ((0, nwh_p - nwh), (0, nw_p - nw))
    cw = np.pad(cw, pad)
    sw = np.pad(sw, pad)
    return jnp.asarray(cw, dtype=dtype), jnp.asarray(sw, dtype=dtype)


# --------------------------------------------------------------------------
# Pallas kernel: one batch row (m) x one z-tile of the combined (d,h) output.
# All operands are bf16; accumulation in f32 on the MXU.
# --------------------------------------------------------------------------
def _irfft3_kernel(xr_ref, xi_ref, cdh_ref, sdh_ref, cw_ref, sw_ref, o_ref):
    xr = xr_ref[0]            # (ndh, nwh_p)  bf16
    xi = xi_ref[0]            # (ndh, nwh_p)  bf16
    cdh = cdh_ref[...]        # (tz, ndh)     bf16
    sdh = sdh_ref[...]        # (tz, ndh)     bf16

    # inverse 2D DFT over (d, h): left-multiply by the (z, k) basis.
    yr = (jnp.dot(cdh, xr, preferred_element_type=jnp.float32)
          - jnp.dot(sdh, xi, preferred_element_type=jnp.float32))
    yi = (jnp.dot(sdh, xr, preferred_element_type=jnp.float32)
          + jnp.dot(cdh, xi, preferred_element_type=jnp.float32))

    # real inverse DFT over w: right-multiply, lane-dense (128-padded) output.
    out = (jnp.dot(yr.astype(jnp.bfloat16), cw_ref[...],
                   preferred_element_type=jnp.float32)
           + jnp.dot(yi.astype(jnp.bfloat16), sw_ref[...],
                     preferred_element_type=jnp.float32))
    o_ref[0] = out            # (tz, nw_p) f32


def _run_irfft3(xr, xi, cdh_t, sdh_t, cw, sw, tz):
    M, ndh, nwh_p = xr.shape
    ndh_p = cdh_t.shape[0]
    nw_p = cw.shape[1]
    n_z = ndh_p // tz
    grid = (M, n_z)

    flops = M * (8 * ndh_p * ndh * nwh_p + 4 * ndh_p * nwh_p * nw_p)
    bytes_accessed = (2 * M * ndh * nwh_p * 2        # xr, xi (bf16)
                      + 2 * ndh_p * ndh * 2          # cdh_t, sdh_t (bf16)
                      + 2 * nwh_p * nw_p * 2         # cw, sw (bf16)
                      + M * ndh_p * nw_p * 4)        # out (f32)

    return pl.pallas_call(
        _irfft3_kernel,
        out_shape=jax.ShapeDtypeStruct((M, ndh_p, nw_p), jnp.float32),
        grid_spec=pltpu.PrefetchScalarGridSpec(
            num_scalar_prefetch=0,
            grid=grid,
            in_specs=[
                # spectrum (re / im): one full row per batch element, constant
                # across the z axis -> fetched once per m step.
                pl.BlockSpec((1, ndh, nwh_p), lambda m, z: (m, 0, 0)),
                pl.BlockSpec((1, ndh, nwh_p), lambda m, z: (m, 0, 0)),
                # (d,h) inverse-DFT basis: z-tile of rows, all mode columns.
                pl.BlockSpec((tz, ndh), lambda m, z: (z, 0)),
                pl.BlockSpec((tz, ndh), lambda m, z: (z, 0)),
                # w inverse-DFT basis: fully resident (constant index_map).
                pl.BlockSpec((nwh_p, nw_p), lambda m, z: (0, 0)),
                pl.BlockSpec((nwh_p, nw_p), lambda m, z: (0, 0)),
            ],
            out_specs=pl.BlockSpec((1, tz, nw_p), lambda m, z: (m, z, 0)),
        ),
        compiler_params=pltpu.CompilerParams(
            dimension_semantics=("parallel", "parallel"),
            vmem_limit_bytes=64 * 1024 * 1024,
        ),
        cost_estimate=pl.CostEstimate(
            flops=flops, transcendentals=0, bytes_accessed=bytes_accessed),
    )(xr, xi, cdh_t, sdh_t, cw, sw)


class InverseRealFFT3:
    """JAX/Pallas port of modulus InverseRealFFT3 (forward pass only)."""

    def __init__(self, nd, nh, nw, ldmax=None, lhmax=None, lwmax=None):
        self.nd, self.nh, self.nw = nd, nh, nw
        self.ldmax = min(ldmax or nd, nd)
        self.lhmax = min(lhmax or nh, nh)
        self.lwmax = min(lwmax or nw // 2 + 1, nw // 2 + 1)
        self.ldmax_high = math.ceil(self.ldmax / 2)
        self.ldmax_low = math.floor(self.ldmax / 2)
        self.nwh = nw // 2 + 1
        if self.lhmax < self.nh:
            # TODO(synk): torch reference's lhmax<nh branch concatenates along
            # dim=-3 (shape bug) and can never run; only lhmax == nh supported.
            raise NotImplementedError("lhmax < nh is not supported")

        # padded / tiled sizes (lane-dense on TPU)
        self.ndh = nd * nh
        self.ndh_p = _round_up(self.ndh, 8)          # sublane-aligned z rows
        self.nwh_p = _round_up(self.nwh, 128)        # lane-aligned kw columns
        self.nw_p = _round_up(self.nw, 128)          # lane-aligned zw columns
        self.tz = _pick_tile(self.ndh_p)

        # deterministic "parameters": small analytic DFT bases, bf16.
        self.cdh_t, self.sdh_t = _build_dh_basis(nd, nh, self.ndh_p)
        self.cw, self.sw = _build_w_basis(nw, self.nwh_p, self.nw_p)

    # ---- glue: place retained modes into the (nd, nh, nwh_p) spectrum ----
    def _assemble_full_spectrum(self, x):
        xt = x[..., : self.lwmax]
        if self.ldmax < self.nd:
            xth = xt[..., : self.ldmax_high, :, :]
            xtl = xt[..., xt.shape[-3] - self.ldmax_low:, :, :]
            zshape = xth.shape[:-3] + (self.nd - self.ldmax,) + xth.shape[-2:]
            xt = jnp.concatenate(
                [xth, jnp.zeros(zshape, dtype=xt.dtype), xtl], axis=-3
            )
        if xt.shape[-1] < self.nwh_p:   # irfftn(s=...) zero-pad + lane padding
            pad = [(0, 0)] * (xt.ndim - 1) + [(0, self.nwh_p - xt.shape[-1])]
            xt = jnp.pad(xt, pad)
        return xt  # (..., nd, nh, nwh_p) complex

    def __call__(self, x):
        xt = self._assemble_full_spectrum(x)
        batch_shape = xt.shape[:-3]
        M = int(np.prod(batch_shape)) if batch_shape else 1

        xr = jnp.real(xt).reshape(M, self.ndh, self.nwh_p).astype(jnp.bfloat16)
        xi = jnp.imag(xt).reshape(M, self.ndh, self.nwh_p).astype(jnp.bfloat16)

        out = _run_irfft3(xr, xi, self.cdh_t, self.sdh_t,
                          self.cw, self.sw, self.tz)     # (M, ndh_p, nw_p) f32
        out = out[:, : self.ndh, : self.nw]
        return out.reshape(batch_shape + (self.nd, self.nh, self.nw))


# ---- pure-JAX reference replicating the torch forward (for verification) ----
def _reference_forward(x, nd, nh, nw, ldmax=None, lhmax=None, lwmax=None):
    ldmax = min(ldmax or nd, nd)
    lwmax = min(lwmax or nw // 2 + 1, nw // 2 + 1)
    ldh, ldl = math.ceil(ldmax / 2), math.floor(ldmax / 2)
    xt = x[..., :lwmax]
    if ldmax < nd:
        xth = xt[..., :ldh, :, :]
        xtl = xt[..., xt.shape[-3] - ldl:, :, :]
        zshape = xth.shape[:-3] + (nd - ldmax,) + xth.shape[-2:]
        xt = jnp.concatenate([xth, jnp.zeros(zshape, xt.dtype), xtl], axis=-3)
    return jnp.fft.irfftn(xt, s=(nd, nh, nw), axes=(-3, -2, -1), norm="ortho")


if __name__ == "__main__":
    B, C = 2, 4
    nd, nh, nw = 8, 8, 16
    ldmax, lwmax = 6, 6          # truncated spectral input (exercise padding)

    key = jax.random.PRNGKey(0)
    kr, ki = jax.random.split(key)
    x_re = jax.random.normal(kr, (B, C, ldmax, nh, lwmax), dtype=jnp.float32)
    x_im = jax.random.normal(ki, (B, C, ldmax, nh, lwmax), dtype=jnp.float32)
    x = x_re + 1j * x_im         # complex64, (B, C, ldmax, nh, lwmax)

    mod = InverseRealFFT3(nd, nh, nw, ldmax=ldmax, lwmax=lwmax)
    out = mod(x)
    out = jax.block_until_ready(out)

    assert out.shape == (B, C, nd, nh, nw), out.shape
    assert out.dtype == jnp.float32, out.dtype

    ref = _reference_forward(x, nd, nh, nw, ldmax=ldmax, lwmax=lwmax)
    ref = jax.block_until_ready(ref)
    err = float(jnp.max(jnp.abs(out - ref)))
    scale = float(jnp.max(jnp.abs(ref))) + 1e-6
    # bf16 MXU operands with f32 accumulation: allow bf16-level error.
    assert err <= 3e-2 * scale, f"max abs err {err} vs scale {scale}"

    print("KERNEL_OK")
</pallas_src>

<mosaic_0001>
module attributes {stable_mosaic.version = 11 : i64} {
  func.func @_irfft3_kernel(%arg0: i32, %arg1: i32, %arg2: memref<1x64x128xbf16, #tpu.memory_space<vmem>>, %arg3: memref<1x64x128xbf16, #tpu.memory_space<vmem>>, %arg4: memref<64x64xbf16, #tpu.memory_space<vmem>>, %arg5: memref<64x64xbf16, #tpu.memory_space<vmem>>, %arg6: memref<128x128xbf16, #tpu.memory_space<vmem>>, %arg7: memref<128x128xbf16, #tpu.memory_space<vmem>>, %arg8: memref<1x64x128xf32, #tpu.memory_space<vmem>>) attributes {dimension_semantics = [#tpu.dimension_semantics<parallel>, #tpu.dimension_semantics<parallel>], iteration_bounds = array<i64: 8, 1>, scalar_prefetch = 0 : i64, scratch_operands = 0 : i64, tpu.core_type = #tpu.core_type<tc>, window_params = [{transform_indices = @transform_0, window_bounds = array<i64: 1, 64, 128>}, {transform_indices = @transform_1, window_bounds = array<i64: 1, 64, 128>}, {transform_indices = @transform_2, window_bounds = array<i64: 64, 64>}, {transform_indices = @transform_3, window_bounds = array<i64: 64, 64>}, {pipeline_mode = #tpu.pipeline_mode<synchronous>, transform_indices = @transform_4, window_bounds = array<i64: 128, 128>}, {pipeline_mode = #tpu.pipeline_mode<synchronous>, transform_indices = @transform_5, window_bounds = array<i64: 128, 128>}, {transform_indices = @transform_6, window_bounds = array<i64: 1, 64, 128>}]} {
    %c0 = arith.constant 0 : index
    %c0_0 = arith.constant 0 : index
    %c0_1 = arith.constant 0 : index
    %0 = vector.load %arg2[%c0, %c0_0, %c0_1] : memref<1x64x128xbf16, #tpu.memory_space<vmem>>, vector<1x64x128xbf16>
    %1 = vector.shape_cast %0 : vector<1x64x128xbf16> to vector<64x128xbf16>
    %c0_2 = arith.constant 0 : index
    %c0_3 = arith.constant 0 : index
    %c0_4 = arith.constant 0 : index
    %2 = vector.load %arg3[%c0_2, %c0_3, %c0_4] : memref<1x64x128xbf16, #tpu.memory_space<vmem>>, vector<1x64x128xbf16>
    %3 = vector.shape_cast %2 : vector<1x64x128xbf16> to vector<64x128xbf16>
    %c0_5 = arith.constant 0 : index
    %c0_6 = arith.constant 0 : index
    %4 = vector.load %arg4[%c0_5, %c0_6] : memref<64x64xbf16, #tpu.memory_space<vmem>>, vector<64x64xbf16>
    %c0_7 = arith.constant 0 : index
    %c0_8 = arith.constant 0 : index
    %5 = vector.load %arg5[%c0_7, %c0_8] : memref<64x64xbf16, #tpu.memory_space<vmem>>, vector<64x64xbf16>
    %cst = arith.constant dense<0.000000e+00> : vector<64x128xf32>
    %6 = tpu.matmul %4, %1, %cst {dimension_numbers = #tpu.dot_dimension_numbers<[1], [0], [0], [1], [0, 0, 1, 1], [], []>} : vector<64x64xbf16>, vector<64x128xbf16>, vector<64x128xf32> -> vector<64x128xf32>
    %cst_9 = arith.constant dense<0.000000e+00> : vector<64x128xf32>
    %7 = tpu.matmul %5, %3, %cst_9 {dimension_numbers = #tpu.dot_dimension_numbers<[1], [0], [0], [1], [0, 0, 1, 1], [], []>} : vector<64x64xbf16>, vector<64x128xbf16>, vector<64x128xf32> -> vector<64x128xf32>
    %8 = arith.subf %6, %7 : vector<64x128xf32>
    %cst_10 = arith.constant dense<0.000000e+00> : vector<64x128xf32>
    %9 = tpu.matmul %5, %1, %cst_10 {dimension_numbers = #tpu.dot_dimension_numbers<[1], [0], [0], [1], [0, 0, 1, 1], [], []>} : vector<64x64xbf16>, vector<64x128xbf16>, vector<64x128xf32> -> vector<64x128xf32>
    %cst_11 = arith.constant dense<0.000000e+00> : vector<64x128xf32>
    %10 = tpu.matmul %4, %3, %cst_11 {dimension_numbers = #tpu.dot_dimension_numbers<[1], [0], [0], [1], [0, 0, 1, 1], [], []>} : vector<64x64xbf16>, vector<64x128xbf16>, vector<64x128xf32> -> vector<64x128xf32>
    %11 = arith.addf %9, %10 : vector<64x128xf32>
    %12 = arith.truncf %8 : vector<64x128xf32> to vector<64x128xbf16>
    %c0_12 = arith.constant 0 : index
    %c0_13 = arith.constant 0 : index
    %13 = vector.load %arg6[%c0_12, %c0_13] : memref<128x128xbf16, #tpu.memory_space<vmem>>, vector<128x128xbf16>
    %cst_14 = arith.constant dense<0.000000e+00> : vector<64x128xf32>
    %14 = tpu.matmul %12, %13, %cst_14 {dimension_numbers = #tpu.dot_dimension_numbers<[1], [0], [0], [1], [0, 0, 1, 1], [], []>} : vector<64x128xbf16>, vector<128x128xbf16>, vector<64x128xf32> -> vector<64x128xf32>
    %15 = arith.truncf %11 : vector<64x128xf32> to vector<64x128xbf16>
    %c0_15 = arith.constant 0 : index
    %c0_16 = arith.constant 0 : index
    %16 = vector.load %arg7[%c0_15, %c0_16] : memref<128x128xbf16, #tpu.memory_space<vmem>>, vector<128x128xbf16>
    %cst_17 = arith.constant dense<0.000000e+00> : vector<64x128xf32>
    %17 = tpu.matmul %15, %16, %cst_17 {dimension_numbers = #tpu.dot_dimension_numbers<[1], [0], [0], [1], [0, 0, 1, 1], [], []>} : vector<64x128xbf16>, vector<128x128xbf16>, vector<64x128xf32> -> vector<64x128xf32>
    %18 = arith.addf %14, %17 : vector<64x128xf32>
    %c0_18 = arith.constant 0 : index
    %c0_19 = arith.constant 0 : index
    %c0_20 = arith.constant 0 : index
    %19 = vector.load %arg8[%c0_18, %c0_19, %c0_20] : memref<1x64x128xf32, #tpu.memory_space<vmem>>, vector<1x64x128xf32>
    %20 = vector.shape_cast %19 : vector<1x64x128xf32> to vector<64x128xf32>
    %21 = vector.shape_cast %18 : vector<64x128xf32> to vector<1x64x128xf32>
    tpu.vector_store %arg8[%c0_18, %c0_19, %c0_20], %21 {strides = array<i32>} : memref<1x64x128xf32, #tpu.memory_space<vmem>>, vector<1x64x128xf32>,
    return
  }
  func.func @transform_0(%arg0: i32, %arg1: i32) -> (i32, i32, i32) {
    %c0_i32 = arith.constant 0 : i32
    %c0_i32_0 = arith.constant 0 : i32
    %c0_i32_1 = arith.constant 0 : i32
    return %arg0, %c0_i32, %c0_i32_0 : i32, i32, i32
  }
  func.func @transform_1(%arg0: i32, %arg1: i32) -> (i32, i32, i32) {
    %c0_i32 = arith.constant 0 : i32
    %c0_i32_0 = arith.constant 0 : i32
    %c0_i32_1 = arith.constant 0 : i32
    return %arg0, %c0_i32, %c0_i32_0 : i32, i32, i32
  }
  func.func @transform_2(%arg0: i32, %arg1: i32) -> (i32, i32) {
    %c0_i32 = arith.constant 0 : i32
    %c0_i32_0 = arith.constant 0 : i32
    return %arg1, %c0_i32 : i32, i32
  }
  func.func @transform_3(%arg0: i32, %arg1: i32) -> (i32, i32) {
    %c0_i32 = arith.constant 0 : i32
    %c0_i32_0 = arith.constant 0 : i32
    return %arg1, %c0_i32 : i32, i32
  }
  func.func @transform_4(%arg0: i32, %arg1: i32) -> (i32, i32) {
    %c0_i32 = arith.constant 0 : i32
    %c0_i32_0 = arith.constant 0 : i32
    %c0_i32_1 = arith.constant 0 : i32
    return %c0_i32, %c0_i32_0 : i32, i32
  }
  func.func @transform_5(%arg0: i32, %arg1: i32) -> (i32, i32) {
    %c0_i32 = arith.constant 0 : i32
    %c0_i32_0 = arith.constant 0 : i32
    %c0_i32_1 = arith.constant 0 : i32
    return %c0_i32, %c0_i32_0 : i32, i32
  }
  func.func @transform_6(%arg0: i32, %arg1: i32) -> (i32, i32, i32) {
    %c0_i32 = arith.constant 0 : i32
    %c0_i32_0 = arith.constant 0 : i32
    return %arg0, %arg1, %c0_i32 : i32, i32, i32
  }
}

</mosaic_0001>

<bundles_post_ra>
// kernel: tpu_custom_call.1
= control target key start
LH: loop header
LB: loop body
LE: loop exit
PB: predicated region body
PF: predicated region fallthrough
CT: control target
= control target key end

     0   :  { %s2358_s0 = inlined_call_operand.hbm [shape: bf16[8,64,128], index: 0, kind: input, shape index: {}]   ;;  %s2359_s1 = inlined_call_operand.hbm [shape: bf16[8,64,128], index: 1, kind: input, shape index: {}]   ;;  %s2360_s2 = inlined_call_operand.hbm [shape: bf16[64,64], index: 2, kind: input, shape index: {}]   ;;  %s2361_s3 = inlined_call_operand.hbm [shape: bf16[64,64], index: 3, kind: input, shape index: {}]   ;;  %s2362_s4 = inlined_call_operand.hbm [shape: bf16[128,128], index: 4, kind: input, shape index: {}]   ;;  %s2363_s5 = inlined_call_operand.hbm [shape: bf16[128,128], index: 5, kind: input, shape index: {}]   ;;  %s2364_s6 = inlined_call_operand.hbm [shape: f32[8,64,128], index: 6, kind: output, shape index: {}]  }
   0x1   :  { %2374 = sst [smem:[#allocation22_spill]] %s2358_s0 }
   0x2   :  { %2375 = sst [smem:[#allocation23_spill]] %s2360_s2 }
   0x3   :  { %2376 = sst [smem:[#allocation24_spill]] %s2361_s3 }
   0x4   :  { %2377 = sst [smem:[#allocation25_spill]] %s2362_s4 }
   0x5   :  { %2378 = sst [smem:[#allocation26_spill]] %s2363_s5 }
   0x6   :  { %11 = vsyncpa [#allocation3], 0 }
   0x7   :  { %13 = vsyncpa [#allocation3 + $0x1], 0 }
   0x8   :  { %14 = vsyncpa [#allocation6], 0 }
   0x9   :  { %16 = vsyncpa [#allocation6 + $0x1], 0 }
   0xa   :  { %17 = vsyncpa [#allocation9], 0 }
   0xb   :  { %18 = vsyncpa [#allocation12], 0 }
   0xc   :  { %19 = vsyncpa [#allocation4], 0 }
   0xd   :  { %21 = vsyncpa [#allocation4 + $0x1], 0  ;;  %s1978_s21 = smov 0   ;;  %s1980_s22 = smov 0  }
   0xe   :  { %s1982_s23 = smov 0   ;;  %s1984_s24 = smov 0  }
   0xf   :  { %s1986_s25 = smov 0   ;;  %s1988_s26 = smov 0  }
  0x10 LB: > { %2379 = sst [smem:[#allocation20_spill]] %s1910_s21  ;;  %s2009_s27 = sadd.s32 4294967295, %s1930_s26   ;;  %s1930_s26 = sphi %s1988_s26, %s27_s26   ;;  %s1926_s25 = sphi %s1986_s25, %s2411_s25   ;;  %s1922_s24 = sphi %s1984_s24, %s2410_s24   ;;  %s1918_s23 = sphi %s1982_s23, %s2409_s23   ;;  %s1914_s22 = sphi %s1980_s22, %s2408_s22   ;;  %s1910_s21 = sphi %s1978_s21, %s2407_s21  }
  0x11   : > { %s1255_s28 = sadd.s32 4294967294, %s1930_s26   ;;  %p59_p0 = scmp.ne.s32.totalorder %s1914_s22, %s1910_s21 }
  0x12   : > { %p2365_p1 = scmp.eq.s32.totalorder %s2009_s27, 0  ;;  %p211_p3 = scmp.eq.s32.totalorder %s1255_s28, 7 }
  0x13   : > { %p1256_p5 = scmp.ge.s32.totalorder %s1930_s26, 1  ;;  %p218_p7 = scmp.lt.s32.totalorder %s1930_s26, 9 }
  0x14   : > { %p2018_p4 = por %p2365_p1, %p59_p0  ;;  %p2023_p6 = por %p211_p3, %p59_p0 }
  0x15   : > { %p2028_p8 = pnand %p1256_p5, %p218_p7  ;;  %s1932_s8 = smov [#allocation7]  }
  0x16   : > { %s2380_s29 = scalar_select %p2018_p4, 1, 0 }
  0x17   : > { %s2381_s30 = scalar_select %p2023_p6, 1, 0 }
  0x18   : > { %s2383_s7 = scalar_select %p2028_p8, 1, 0 }
  0x19   : > { %2382 = sst [smem:[#allocation21_spill]] %s2381_s30  ;;  %s233_s9 = sshll.u32 %s1932_s8, 4  ;;  %s2032_s9 = int_to_ptr.vmem [resolvable:$true] %s233_s9 }
  0x1a   : > { %p1538_p9 = pneg %p2028_p8  ;;  %s1933_s11 = smov [#allocation8]  }
  0x1b   : > { %s249_s12 = sshll.u32 %s1933_s11, 4  ;;  %s1934_s13 = smov [#allocation10]   ;;  %s2042_s12 = int_to_ptr.vmem [resolvable:$true] %s249_s12 }
  0x1c   : > { %p2038_p10 = pnand %p1538_p9, %p2365_p1  ;;  %s2044_s14 = sshll.u32 %s1934_s13, 4  ;;  %s263_s14 = int_to_ptr.vmem [resolvable:$true] %s2044_s14 }
  0x1d   : > { %s2385_s2 = sld [smem:[#allocation23_spill]] }
  0x1e   : > { %p2054_p12 = pneg %p2038_p10 }
  0x23   : > { %s1660_s17 = scalar_lea.hbm %s2385_s2, 512 }
  0x24   : > { %p1661_p11 = scmp.ne.s32.totalorder %s2385_s2, %s1660_s17  ;;  %p1667_p3 = scmp.lt.u32.totalorder %s1660_s17, %s2385_s2 }
  0x26   : > { %p1663_p13 = pnand %p2054_p12, %p1661_p11 }
  0x28   : > { %p1664_p0 = pneg %p1663_p13 }
  0x2a   : > { %p1669_p5 = pnand %p1667_p3, %p1664_p0 }
  0x2c   : > { %1672 = shalt.err (!%p1669_p5)
}
  0x2d   : > { %s1673_s11 = scalar_lea.vmem %s2032_s9, 512  ;;  %p1681_p2 = scmp.lt.s32.totalorder %s2032_s9, %s2032_s9 }
  0x2e   : > { %p1674_p7 = scmp.ne.s32.totalorder %s2032_s9, %s1673_s11  ;;  %p1682_p6 = scmp.lt.s32.totalorder %s1673_s11, %s1673_s11 }
  0x30   : > { %p1676_p9 = pnand %p1674_p7, %p2054_p12  ;;  %p1683_p11 = por %p1682_p6, %p1681_p2 }
  0x32   : > { %p1677_p1 = pneg %p1676_p9 }
  0x34   : > { %p1684_p13 = pnand %p1683_p11, %p1677_p1 }
  0x36   : > { %1687 = shalt.err (!%p1684_p13)
}
  0x37   : > { %s2370_s13 = smov 64   ;;  %s2372_s15 = smov 4  }
  0x38   : > { %1541 = dma.hbm_to_vmem [thread:$0]  (!%p2038_p10), %s2385_s2, 512, %s2032_s9, [#allocation6], %s2370_s13, %s2370_s13, %s2372_s15  }
  0x39   : > { %s2387_s3 = sld [smem:[#allocation24_spill]] }
  0x3f   : > { %s1688_s28 = scalar_lea.hbm %s2387_s3, 512 }
  0x40   : > { %p1689_p1 = scmp.ne.s32.totalorder %s2387_s3, %s1688_s28  ;;  %p1695_p0 = scmp.lt.u32.totalorder %s1688_s28, %s2387_s3 }
  0x42   : > { %p1691_p2 = pnand %p1689_p1, %p2054_p12 }
  0x44   : > { %p1692_p6 = pneg %p1691_p2 }
  0x46   : > { %p1697_p3 = pnand %p1695_p0, %p1692_p6 }
  0x48   : > { %1700 = shalt.err (!%p1697_p3)
}
  0x49   : > { %s1701_s9 = scalar_lea.vmem %s2042_s12, 512  ;;  %p1709_p11 = scmp.lt.s32.totalorder %s2042_s12, %s2042_s12 }
  0x4a   : > { %p1702_p5 = scmp.ne.s32.totalorder %s2042_s12, %s1701_s9  ;;  %p1710_p13 = scmp.lt.s32.totalorder %s1701_s9, %s1701_s9 }
  0x4c   : > { %p1704_p7 = pnand %p1702_p5, %p2054_p12  ;;  %p1711_p1 = por %p1710_p13, %p1709_p11 }
  0x4e   : > { %p1705_p9 = pneg %p1704_p7 }
  0x50   : > { %p1712_p2 = pnand %p1711_p1, %p1705_p9 }
  0x52   : > { %1715 = shalt.err (!%p1712_p2)
}
  0x53   : > { %1544 = dma.hbm_to_vmem [thread:$0]  (!%p2038_p10), %s2387_s3, 512, %s2042_s12, [#allocation9], %s2370_s13, %s2370_s13, %s2372_s15  }
  0x54   : > { %s2388_s4 = sld [smem:[#allocation25_spill]] }
  0x5a   : > { %s1716_s18 = scalar_lea.hbm %s2388_s4, 1024 }
  0x5b   : > { %p1717_p6 = scmp.ne.s32.totalorder %s2388_s4, %s1716_s18  ;;  %p1723_p5 = scmp.lt.u32.totalorder %s1716_s18, %s2388_s4 }
  0x5d   : > { %p1719_p0 = pnand %p1717_p6, %p2054_p12 }
  0x5f   : > { %p1720_p3 = pneg %p1719_p0 }
  0x61   : > { %p1725_p7 = pnand %p1723_p5, %p1720_p3 }
  0x63   : > { %1728 = shalt.err (!%p1725_p7)
}
  0x64   : > { %s1729_s9 = scalar_lea.vmem %s263_s14, 1024  ;;  %p1737_p1 = scmp.lt.s32.totalorder %s263_s14, %s263_s14 }
  0x65   : > { %p1730_p9 = scmp.ne.s32.totalorder %s263_s14, %s1729_s9  ;;  %p1738_p2 = scmp.lt.s32.totalorder %s1729_s9, %s1729_s9 }
  0x67   : > { %p1732_p11 = pnand %p1730_p9, %p2054_p12  ;;  %p1739_p4 = por %p1738_p2, %p1737_p1 }
  0x69   : > { %p1733_p13 = pneg %p1732_p11 }
  0x6b   : > { %p1740_p8 = pnand %p1739_p4, %p1733_p13 }
  0x6d   : > { %1743 = shalt.err (!%p1740_p8)
}
  0x6e   : > { %1547 = dma.hbm_to_vmem [thread:$0]  (!%p2038_p10), %s2388_s4, 1024, %s263_s14, [#allocation9], %s2370_s13, %s2370_s13, %s2372_s15  }
  0x6f   : > { %s1937_s30 = smov [#allocation11]   ;;  %s2389_s5 = sld [smem:[#allocation26_spill]] }
  0x70   : > { %s275_s16 = sshll.u32 %s1937_s30, 4  ;;  %s276_s16 = int_to_ptr.vmem [resolvable:$true] %s275_s16 }
  0x75   : > { %s1744_s19 = scalar_lea.hbm %s2389_s5, 1024 }
  0x76   : > { %p1745_p4 = scmp.ne.s32.totalorder %s2389_s5, %s1744_s19  ;;  %p1751_p0 = scmp.lt.u32.totalorder %s1744_s19, %s2389_s5 }
  0x78   : > { %p1747_p8 = pnand %p1745_p4, %p2054_p12 }
  0x7a   : > { %p1748_p6 = pneg %p1747_p8 }
  0x7c   : > { %p1753_p3 = pnand %p1751_p0, %p1748_p6 }
  0x7e   : > { %1756 = shalt.err (!%p1753_p3)
}
  0x7f   : > { %s1757_s14 = scalar_lea.vmem %s276_s16, 1024  ;;  %p1765_p11 = scmp.lt.s32.totalorder %s276_s16, %s276_s16 }
  0x80   : > { %p1758_p5 = scmp.ne.s32.totalorder %s276_s16, %s1757_s14  ;;  %p1766_p13 = scmp.lt.s32.totalorder %s1757_s14, %s1757_s14 }
  0x82   : > { %p1760_p7 = pnand %p1758_p5, %p2054_p12  ;;  %p1767_p1 = por %p1766_p13, %p1765_p11 }
  0x84   : > { %p1761_p9 = pneg %p1760_p7 }
  0x86   : > { %p1768_p2 = pnand %p1767_p1, %p1761_p9 }
  0x88   : > { %1771 = shalt.err (!%p1768_p2)
}
  0x89   : > { %1550 = dma.hbm_to_vmem [thread:$0]  (!%p2038_p10), %s2389_s5, 1024, %s276_s16, [#allocation12], %s2370_s13, %s2370_s13, %s2372_s15  }
  0x8a   : > { %s39_s20 = sadd.s32 1, %s1926_s25  ;;  %s46_s10 = sadd.s32 1, %s1918_s23 }
  0x8b   : > { %p41_p12 = scmp.ge.s32.totalorder %s39_s20, 8  ;;  %p53_p4 = scmp.ne.s32.totalorder %s1918_s23, %s1914_s22 }
  0x8c   : > { %p54_p8 = scmp.eq.s32.totalorder %s1930_s26, 0  ;;  %p1566_p6 = scmp.lt.s32.totalorder %s1930_s26, 8 }
  0x8d   : > { %s2413_s20 = smov (%p41_p12, %s39_s20), 0  ;;  %p2390_p3 = scmp.eq.s32.totalorder %s2009_s27, 7 }
  0x8e   : > { %p55_p0 = por %p54_p8, %p53_p4  ;;  %s43_s17 = ssub.s32 %s1926_s25, %s2413_s20 }
  0x8f   : > { %p2157_p5 = por %p2390_p3, %p53_p4  ;;  %s289_s18 = sand.u32 1, %s1918_s23  }
  0x90   : > { %p44_p7 = scmp.eq.s32.totalorder %s43_s17, 0  ;;  %s2164_s16 = sshll.u32 %s289_s18, 5 }
  0x91   : > { %s1329_s19 = sshll.u32 %s1926_s25, 9  ;;  %s2392_s0 = sld [smem:[#allocation22_spill]] }
  0x92   : > { %s2168_s28 = scalar_select %p44_p7, %s1918_s23, %s46_s10  }
  0x93   : > { %s293_s14 = scalar_lea.vmem [#allocation2], %s2164_s16  ;;  %p2178_p10 = pnand %p1566_p6, %p55_p0 }
  0x94   : > { %s300_s12 = sshll.u32 %s293_s14, 4  ;;  %s2187_s8 = scalar_lea.hbm %s2359_s1, %s1329_s19  ;;  %s2182_s12 = int_to_ptr.vmem [resolvable:$true] %s300_s12 }
  0x95   : > { %s2189_s11 = scalar_lea.sflag [#allocation3], %s289_s18  ;;  %p1774_p11 = pneg %p2178_p10 }
  0x97   : > { %s2173_s9 = scalar_lea.hbm %s2392_s0, %s1329_s19  ;;  %s1777_s2 = scalar_lea.hbm %s2392_s0, 4096 }
  0x98   : > { %s1772_s13 = scalar_lea.hbm %s2173_s9, 512  ;;  %p1778_p2 = scmp.lt.u32.totalorder %s2173_s9, %s2392_s0 }
  0x99   : > { %p1773_p9 = scmp.ne.s32.totalorder %s2173_s9, %s1772_s13  ;;  %p1779_p12 = scmp.lt.u32.totalorder %s1777_s2, %s1772_s13 }
  0x9a   : > { %p1781_p8 = scmp.lt.u32.totalorder %s1772_s13, %s2173_s9 }
  0x9b   : > { %p1775_p13 = pnand %p1774_p11, %p1773_p9  ;;  %p1780_p4 = por %p1779_p12, %p1778_p2 }
  0x9d   : > { %p1776_p1 = pneg %p1775_p13  ;;  %p1782_p6 = por %p1781_p8, %p1780_p4 }
  0x9f   : > { %p1783_p0 = pnand %p1782_p6, %p1776_p1 }
  0xa1   : > { %1786 = shalt.err (!%p1783_p0)
}
  0xa2   : > { %s1787_s18 = scalar_lea.vmem %s2182_s12, 512  ;;  %s1938_s15 = smov [#allocation2]  }
  0xa3   : > { %p1788_p3 = scmp.ne.s32.totalorder %s2182_s12, %s1787_s18  ;;  %s1792_s19 = sshll.u32 %s1938_s15, 4  ;;  %s1793_s19 = int_to_ptr.vmem [resolvable:$false] %s1792_s19 }
  0xa4   : > { %s1794_s3 = scalar_lea.vmem %s1793_s19, 1024  ;;  %p1795_p13 = scmp.lt.s32.totalorder %s2182_s12, %s1793_s19 }
  0xa5   : > { %p1790_p7 = pnand %p1788_p3, %p1774_p11  ;;  %p1796_p2 = scmp.lt.s32.totalorder %s1794_s3, %s1787_s18 }
  0xa7   : > { %p1791_p9 = pneg %p1790_p7  ;;  %p1797_p12 = por %p1796_p2, %p1795_p13 }
  0xa9   : > { %p1798_p4 = pnand %p1797_p12, %p1791_p9 }
  0xab   : > { %1801 = shalt.err (!%p1798_p4)
}
  0xac   : > { %s2394_s2 = smov 4   ;;  %s2395_s4 = smov 64  }
  0xad   : > { %1554 = dma.hbm_to_vmem [thread:$0]  (!%p2178_p10), %s2173_s9, 512, %s2182_s12, %s2189_s11, %s2395_s4, %s2395_s4, %s2394_s2  }
  0xae   : > { %s314_s13 = scalar_lea.vmem [#allocation5], %s2164_s16  ;;  %s310_s17 = sand.u32 1, %s1930_s26  }
  0xaf   : > { %s321_s10 = sshll.u32 %s314_s13, 4  ;;  %s2224_s14 = scalar_lea.sflag [#allocation6], %s310_s17  ;;  %s2222_s10 = int_to_ptr.vmem [resolvable:$true] %s321_s10 }
  0xb0   : > { %s1802_s18 = scalar_lea.hbm %s2187_s8, 512  ;;  %s1807_s3 = scalar_lea.hbm %s2359_s1, 4096 }
  0xb1   : > { %p1803_p1 = scmp.ne.s32.totalorder %s2187_s8, %s1802_s18  ;;  %p1808_p0 = scmp.lt.u32.totalorder %s2187_s8, %s2359_s1 }
  0xb2   : > { %p1809_p3 = scmp.lt.u32.totalorder %s1807_s3, %s1802_s18  ;;  %p1811_p9 = scmp.lt.u32.totalorder %s1802_s18, %s2187_s8 }
  0xb3   : > { %p1805_p8 = pnand %p1803_p1, %p1774_p11 }
  0xb4   : > { %p1810_p7 = por %p1809_p3, %p1808_p0 }
  0xb5   : > { %p1806_p6 = pneg %p1805_p8 }
  0xb6   : > { %p1812_p13 = por %p1811_p9, %p1810_p7 }
  0xb8   : > { %p1813_p2 = pnand %p1812_p13, %p1806_p6 }
  0xba   : > { %1816 = shalt.err (!%p1813_p2)
}
  0xbb   : > { %s1817_s16 = scalar_lea.vmem %s2222_s10, 512  ;;  %s1939_s9 = smov [#allocation5]  }
  0xbc   : > { %p1818_p12 = scmp.ne.s32.totalorder %s2222_s10, %s1817_s16  ;;  %s1822_s12 = sshll.u32 %s1939_s9, 4  ;;  %s1823_s12 = int_to_ptr.vmem [resolvable:$false] %s1822_s12 }
  0xbd   : > { %s1824_s0 = scalar_lea.vmem %s1823_s12, 1024  ;;  %p1825_p8 = scmp.lt.s32.totalorder %s2222_s10, %s1823_s12 }
  0xbe   : > { %p1820_p4 = pnand %p1818_p12, %p1774_p11  ;;  %p1826_p0 = scmp.lt.s32.totalorder %s1824_s0, %s1817_s16 }
  0xc0   : > { %p1821_p1 = pneg %p1820_p4  ;;  %p1827_p3 = por %p1826_p0, %p1825_p8 }
  0xc2   : > { %p1828_p7 = pnand %p1827_p3, %p1821_p1 }
  0xc4   : > { %1831 = shalt.err (!%p1828_p7)
}
  0xc5   : > { %1557 = dma.hbm_to_vmem [thread:$0]  (!%p2178_p10), %s2187_s8, 512, %s2222_s10, %s2224_s14, %s2395_s4, %s2395_s4, %s2394_s2  }
  0xc6   : > { %p2396_p11 = scmp.ne.s32.totalorder %s2383_s7, 0 }
  0xc7   : > { %s2256_s5 = sand.u32 (!%p2396_p11), 1, %s1914_s22   ;;  %p2397_p6 = scmp.ne.s32.totalorder (!%p2396_p11), %s2380_s29, 0 }
  0xc8   : > { %333 = sbr.rel (%p2396_p11) target bundleno = 774 (0x306), region = 44  ;;  %s1269_s11 = sshll.u32 (!%p2396_p11), %s2256_s5, 5 }
  0xc9   : > { %s336_s13 = scalar_lea.sflag (!%p2396_p11), [#allocation3], %s2256_s5  ;;  %s339_s17 = scalar_lea.vmem (!%p2396_p11), [#allocation2], %s1269_s11 }
  0xcf   : > { %1885 = dma.done.wait (%p2397_p6), %s336_s13, 512  }
  0xd0   : > { %1887 = vsyncadd (%p2397_p6), %s336_s13, 4294966784  ;;  %s344_s21 = sand.u32 1, %s2009_s27   ;;  %s2265_s7 = scalar_lea.vmem [#allocation5], %s1269_s11 }
  0xd1   : > { %s345_s8 = scalar_lea.sflag [#allocation6], %s344_s21 }
  0xd2   : > { %1889 = dma.done.wait (%p2397_p6), %s345_s8, 512  }
  0xd3   : > { %1891 = vsyncadd (%p2397_p6), %s345_s8, 4294966784  ;;  %p2398_p10 = scmp.eq.s32.totalorder %s2009_s27, 0 }
  0xd5   : > { %1893 = dma.done.wait (%p2398_p10), [#allocation6], 512   ;;  %p2399_p9 = pmov %p2398_p10 }
  0xd7   : > { %1895 = vsyncadd (%p2399_p9), [#allocation6], 4294966784  ;;  %p2400_p13 = pmov %p2399_p9 }
  0xd8   : > { %p2401_p2 = pmov %p2399_p9 }
  0xd9   : > { %1897 = dma.done.wait (%p2400_p13), [#allocation9], 1536  }
  0xda   : > { %1899 = vsyncadd (%p2401_p2), [#allocation9], 4294965760  ;;  %p2402_p12 = pmov %p2401_p2 }
  0xdb   : > { %p2403_p4 = pmov %p2401_p2 }
  0xdc   : > { %1901 = dma.done.wait (%p2402_p12), [#allocation12], 1024  }
  0xdd   : > { %1903 = vsyncadd (%p2403_p4), [#allocation12], 4294966272  ;;  %v1628_v0 = vld [vmem:[%s339_s17] sm:$0xff]   ;;  %v1629_v1 = vld [vmem:[%s339_s17 + $0x8] sm:$0xff]   ;;  %vm478_vm0 = vcmask 523264   ;;  %s1275_s27 = sshll.u32 %s2256_s5, 6 }
  0xde   : > { %1388 = vmatprep.subr.bf16.mxu0 %v1628_v0  ;;  %v1630_v2 = vld [vmem:[%s339_s17 + $0x10] sm:$0xff]   ;;  %v1632_v3 = vld [vmem:[#allocation7] sm:$0xff]   ;;  %v1631_v4 = vld [vmem:[%s339_s17 + $0x18] sm:$0xff]   ;;  %s397_s29 = scalar_lea.vmem [#allocation13], %s1275_s27  ;;  %s1331_s4 = sshll.u32 %s1922_s24, 10 }
  0xdf   : > { %1389 = vmatpush3.bf16.msra.mxu0 %v1628_v0  ;;  %1396 = vmatprep.mubr.msk.bf16.mxu0 %vm478_vm0, %v1632_v3  ;;  %v1634_v5 = vld [vmem:[%s2265_s7] sm:$0xff]   ;;  %v1633_v6 = vld [vmem:[#allocation7 + $0x8] sm:$0xff]   ;;  %v1636_v8 = vld [vmem:[#allocation7 + $0x10] sm:$0xff]   ;;  %s1105_s2 = sshll.u32 %s397_s29, 4  ;;  %s2310_s18 = scalar_lea.hbm %s2364_s6, %s1331_s4  ;;  %s2305_s2 = int_to_ptr.vmem [resolvable:$true] %s1105_s2 }
  0xe0   : > { %1390 = vmatprep.subr.bf16.mxu0 %v1629_v1  ;;  %v1635_v7 = vld [vmem:[%s2265_s7 + $0x8] sm:$0xff]   ;;  %v1638_v9 = vld [vmem:[%s2265_s7 + $0x10] sm:$0xff]   ;;  %v1637_v10 = vld [vmem:[#allocation7 + $0x18] sm:$0xff]   ;;  %s1090_s15 = scalar_lea.sflag [#allocation4], %s2256_s5  ;;  %s1832_s24 = scalar_lea.vmem %s2305_s2, 1024 }
  0xe1   : > { %v1640_v11 = vld [vmem:[#allocation8] sm:$0xff]   ;;  %v1639_v12 = vld [vmem:[%s2265_s7 + $0x18] sm:$0xff]   ;;  %v1641_v13 = vld [vmem:[#allocation8 + $0x8] sm:$0xff]   ;;  %p1833_p1 = scmp.ne.s32.totalorder %s2305_s2, %s1832_s24  ;;  %s1940_s19 = smov [#allocation13]  }
  0xe2   : > { %v1642_v14 = vld [vmem:[#allocation8 + $0x10] sm:$0xff]   ;;  %v1643_v15 = vld [vmem:[#allocation8 + $0x18] sm:$0xff]   ;;  %v1644_v16 = vld [vmem:[#allocation11] sm:$0xff]   ;;  %s1836_s3 = sshll.u32 %s1940_s19, 4  ;;  %s1837_s3 = int_to_ptr.vmem [resolvable:$false] %s1836_s3 }
  0xe3   : > { %1391 = vmatpush3.bf16.msra.mxu0 %v1629_v1  ;;  %1452 = vmatprep.subr.bf16.mxu1 %v1644_v16  ;;  %v1645_v17 = vld [vmem:[#allocation11 + $0x8] sm:$0xff]   ;;  %v1646_v18 = vld [vmem:[#allocation11 + $0x10] sm:$0xff]   ;;  %v1647_v19 = vld [vmem:[#allocation11 + $0x18] sm:$0xff]   ;;  %p1834_p8 = pnand %p1833_p1, %p2157_p5  ;;  %s1838_s16 = scalar_lea.vmem %s1837_s3, 2048 }
  0xe4   : > { %1392 = vmatprep.subr.bf16.mxu0 %v1630_v2  ;;  %1453 = vmatpush3.bf16.msra.mxu1 %v1644_v16  ;;  %v1648_v20 = vld [vmem:[#allocation11 + $0x20] sm:$0xff]   ;;  %v1649_v21 = vld [vmem:[#allocation11 + $0x28] sm:$0xff]   ;;  %v1650_v22 = vld [vmem:[#allocation11 + $0x30] sm:$0xff]   ;;  %p1839_p3 = scmp.lt.s32.totalorder %s2305_s2, %s1837_s3  ;;  %p1840_p7 = scmp.lt.s32.totalorder %s1838_s16, %s1832_s24 }
  0xe5   : > { %1454 = vmatprep.subr.bf16.mxu1 %v1645_v17  ;;  %v1651_v23 = vld [vmem:[#allocation11 + $0x38] sm:$0xff]   ;;  %v1652_v24 = vld [vmem:[#allocation10] sm:$0xff]   ;;  %v1653_v59 = vld [vmem:[#allocation10 + $0x8] sm:$0xff]   ;;  %p1835_p0 = pneg %p1834_p8 }
  0xe6   : > { %v1654_v62 = vld [vmem:[#allocation10 + $0x10] sm:$0xff]   ;;  %p1841_p11 = por %p1840_p7, %p1839_p3 }
  0xe7   : > { %1393 = vmatpush3.bf16.msra.mxu0 %v1630_v2 }
  0xe8   : > { %1394 = vmatprep.subr.bf16.mxu0 %v1631_v4  ;;  %1455 = vmatpush3.bf16.msra.mxu1 %v1645_v17  ;;  %p1842_p6 = pnand %p1841_p11, %p1835_p0 }
  0xe9   : > { %1456 = vmatprep.subr.bf16.mxu1 %v1646_v18 }
  0xeb   : > { %1395 = vmatpush3.bf16.msra.mxu0 %v1631_v4 }
  0xec   : > { %1404 = vmatprep.subr.bf16.mxu0 %v1634_v5  ;;  %1457 = vmatpush3.bf16.msra.mxu1 %v1646_v18 }
  0xed   : > { %1458 = vmatprep.subr.bf16.mxu1 %v1647_v19 }
  0xee   : > { %1397 = vmatmul.mubr.msk.bf16.vlgmr.msra.gmra.mrb[0].mxu0 %vm478_vm0, %v1633_v6 }
  0xef   : > { %1405 = vmatpush3.bf16.msra.mxu0 %v1634_v5  ;;  %1400 = vmatprep.mubr.msk.bf16.mxu0 %vm478_vm0, %v1636_v8 }
  0xf0   : > { %1406 = vmatprep.subr.bf16.mxu0 %v1635_v7  ;;  %1459 = vmatpush3.bf16.msra.mxu1 %v1647_v19 }
  0xf1   : > { %1460 = vmatprep.subr.bf16.mxu1 %v1648_v20 }
  0xf3   : > { %1407 = vmatpush3.bf16.msra.mxu0 %v1635_v7 }
  0xf4   : > { %1408 = vmatprep.subr.bf16.mxu0 %v1638_v9  ;;  %1461 = vmatpush3.bf16.msra.mxu1 %v1648_v20 }
  0xf5   : > { %1462 = vmatprep.subr.bf16.mxu1 %v1649_v21 }
  0xf6   : > { %1401 = vmatmul.mubr.msk.bf16.gmra.mrb[4].mxu0 %vm478_vm0, %v1637_v10 }
  0xf7   : > { %1409 = vmatpush3.bf16.msra.mxu0 %v1638_v9  ;;  %1412 = vmatprep.mubr.msk.bf16.mxu0 %vm478_vm0, %v1640_v11 }
  0xf8   : > { %1410 = vmatprep.subr.bf16.mxu0 %v1639_v12  ;;  %1463 = vmatpush3.bf16.msra.mxu1 %v1649_v21 }
  0xf9   : > { %1464 = vmatprep.subr.bf16.mxu1 %v1650_v22 }
  0xfb   : > { %1411 = vmatpush3.bf16.msra.mxu0 %v1639_v12 }
  0xfc   : > { %1420 = vmatprep.subr.bf16.mxu0 %v1634_v5  ;;  %1465 = vmatpush3.bf16.msra.mxu1 %v1650_v22 }
  0xfd   : > { %1466 = vmatprep.subr.bf16.mxu1 %v1651_v23 }
  0xfe   : > { %1413 = vmatmul.mubr.msk.bf16.vlgmr.msra.gmra.mrb[8].mxu0 %vm478_vm0, %v1641_v13 }
  0xff   : > { %1421 = vmatpush3.bf16.msra.mxu0 %v1634_v5  ;;  %1416 = vmatprep.mubr.msk.bf16.mxu0 %vm478_vm0, %v1642_v14  ;;  %v1657_v5 = vld [vmem:[#allocation10 + $0x28] sm:$0xff]  }
 0x100   : > { %1422 = vmatprep.subr.bf16.mxu0 %v1635_v7  ;;  %1467 = vmatpush3.bf16.msra.mxu1 %v1651_v23 }
 0x101   : > { %1476 = vmatprep.subr.bf16.mxu1 %v1652_v24 }
 0x103   : > { %1423 = vmatpush3.bf16.msra.mxu0 %v1635_v7  ;;  %v1659_v7 = vld [vmem:[#allocation10 + $0x38] sm:$0xff]  }
 0x104   : > { %1424 = vmatprep.subr.bf16.mxu0 %v1638_v9 }
 0x106   : > { %1417 = vmatmul.mubr.msk.bf16.gmra.mrb[12].mxu0 %vm478_vm0, %v1643_v15 }
 0x107   : > { %1425 = vmatpush3.bf16.msra.mxu0 %v1638_v9  ;;  %1428 = vmatprep.mubr.msk.bf16.mxu0 %vm478_vm0, %v1632_v3  ;;  %v1655_v3 = vld [vmem:[#allocation10 + $0x18] sm:$0xff]  }
 0x108   : > { %1426 = vmatprep.subr.bf16.mxu0 %v1639_v12 }
 0x10b   : > { %1427 = vmatpush3.bf16.msra.mxu0 %v1639_v12 }
 0x10c   : > { %1436 = vmatprep.subr.bf16.mxu0 %v1628_v0 }
 0x10e   : > { %1429 = vmatmul.mubr.msk.bf16.vlgmr.msra.gmra.mrb[16].mxu0 %vm478_vm0, %v1633_v6  ;;  %v1658_v6 = vld [vmem:[#allocation10 + $0x30] sm:$0xff]  }
 0x10f   : > { %1437 = vmatpush3.bf16.msra.mxu0 %v1628_v0  ;;  %1432 = vmatprep.mubr.msk.bf16.mxu0 %vm478_vm0, %v1636_v8 }
 0x110   : > { %1438 = vmatprep.subr.bf16.mxu0 %v1629_v1 }
 0x113   : > { %1439 = vmatpush3.bf16.msra.mxu0 %v1629_v1 }
 0x114   : > { %1440 = vmatprep.subr.bf16.mxu0 %v1630_v2 }
 0x116   : > { %1433 = vmatmul.mubr.msk.bf16.gmra.mrb[20].mxu0 %vm478_vm0, %v1637_v10 }
 0x117   : > { %1441 = vmatpush3.bf16.msra.mxu0 %v1630_v2  ;;  %1444 = vmatprep.mubr.msk.bf16.mxu0 %vm478_vm0, %v1640_v11 }
 0x118   : > { %1442 = vmatprep.subr.bf16.mxu0 %v1631_v4 }
 0x11b   : > { %1443 = vmatpush3.bf16.msra.mxu0 %v1631_v4  ;;  %v1656_v4 = vld [vmem:[#allocation10 + $0x20] sm:$0xff]  }
 0x11e   : > { %1445 = vmatmul.mubr.msk.bf16.vlgmr.msra.gmra.mrb[16].mxu0 %vm478_vm0, %v1641_v13 }
 0x11f   : > { %1448 = vmatprep.mubr.msk.bf16.mxu0 %vm478_vm0, %v1642_v14 }
 0x126   : > { %1449 = vmatmul.mubr.msk.bf16.gmra.mrb[20].mxu0 %vm478_vm0, %v1643_v15 }
 0x1c1   : > { %v1398_v25 = vpop.f32.mrb[0].mxu0 }
 0x1c2   : > { %v525_v26 = vpop.f32.mrb[1].mxu0 }
 0x1c3   : > { %v1399_v27 = vpop.f32.mrb[2].mxu0 }
 0x1c4   : > { %v528_v28 = vpop.f32.mrb[3].mxu0 }
 0x1c9   : > { %v1402_v29 = vpop.f32.mrb[4].mxu0 }
 0x1ca   : > { %v541_v30 = vpop.f32.mrb[5].mxu0 }
 0x1cb   : > { %v1403_v31 = vpop.f32.mrb[6].mxu0 }
 0x1cc   : > { %v544_v32 = vpop.f32.mrb[7].mxu0 }
 0x1d1   : > { %v1414_v33 = vpop.f32.mrb[8].mxu0 }
 0x1d2   : > { %v679_v34 = vsub.f32 %v1398_v25, %v1414_v33  ;;  %v646_v35 = vpop.f32.mrb[9].mxu0 }
 0x1d3   : > { %v677_v36 = vsub.f32 %v525_v26, %v646_v35  ;;  %v1415_v37 = vpop.f32.mrb[10].mxu0 }
 0x1d4   : > { %v680_v38 = vsub.f32 %v1399_v27, %v1415_v37  ;;  %v649_v39 = vpop.f32.mrb[11].mxu0 }
 0x1d5   : > { %v678_v40 = vsub.f32 %v528_v28, %v649_v39 }
 0x1d6   : > { %v816_v41 = vpack.c.bf16 %v680_v38, %v679_v34 }
 0x1d7   : > { %v815_v42 = vpack.c.bf16 %v678_v40, %v677_v36 }
 0x1d9   : > { %v1418_v43 = vpop.f32.mrb[12].mxu0 }
 0x1da   : > { %v683_v44 = vsub.f32 %v1402_v29, %v1418_v43  ;;  %v662_v45 = vpop.f32.mrb[13].mxu0 }
 0x1db   : > { %v681_v46 = vsub.f32 %v541_v30, %v662_v45  ;;  %v1419_v47 = vpop.f32.mrb[14].mxu0 }
 0x1dc   : > { %v684_v48 = vsub.f32 %v1403_v31, %v1419_v47  ;;  %v665_v49 = vpop.f32.mrb[15].mxu0 }
 0x1dd   : > { %v682_v50 = vsub.f32 %v544_v32, %v665_v49 }
 0x1de   : > { %v818_v51 = vpack.c.bf16 %v684_v48, %v683_v44 }
 0x1df   : > { %v817_v52 = vpack.c.bf16 %v682_v50, %v681_v46 }
 0x1f1   : > { %v1446_v53 = vpop.f32.mrb[16].mxu0 }
 0x1f2   : > { %v784_v54 = vpop.f32.mrb[17].mxu0 }
 0x1f3   : > { %v1447_v55 = vpop.f32.mrb[18].mxu0 }
 0x1f4   : > { %v836_v56 = vpack.c.bf16 %v1447_v55, %v1446_v53  ;;  %v787_v57 = vpop.f32.mrb[19].mxu0 }
 0x1f5   : > { %v835_v58 = vpack.c.bf16 %v787_v57, %v784_v54 }
 0x1f7   : > { %1468 = vmatprep.mubr.bf16.mxu1 %v835_v58 }
 0x1f8   : > { %1469 = vmatmul.mubr.bf16.vlgmr.msra.gmra.mrb[0].mxu1 %v836_v56 }
 0x1f9   : > { %1477 = vmatpush3.bf16.msra.mxu1 %v1652_v24  ;;  %v1450_v60 = vpop.f32.mrb[20].mxu0 }
 0x1fa   : > { %v800_v61 = vpop.f32.mrb[21].mxu0  ;;  %1478 = vmatprep.subr.bf16.mxu1 %v1653_v59 }
 0x1fb   : > { %v1451_v63 = vpop.f32.mrb[22].mxu0 }
 0x1fc   : > { %v838_v0 = vpack.c.bf16 %v1451_v63, %v1450_v60  ;;  %v803_v1 = vpop.f32.mrb[23].mxu0 }
 0x1fd   : > { %v837_v2 = vpack.c.bf16 %v803_v1, %v800_v61  ;;  %1479 = vmatpush3.bf16.msra.mxu1 %v1653_v59 }
 0x1fe   : > { %1480 = vmatprep.subr.bf16.mxu1 %v1654_v62 }
 0x1ff   : > { %1472 = vmatprep.mubr.bf16.mxu1 %v837_v2 }
 0x200   : > { %1473 = vmatmul.mubr.bf16.gmra.mrb[4].mxu1 %v838_v0 }
 0x201   : > { %1481 = vmatpush3.bf16.msra.mxu1 %v1654_v62  ;;  %1492 = vmatprep.mubr.bf16.mxu1 %v815_v42 }
 0x202   : > { %1482 = vmatprep.subr.bf16.mxu1 %v1655_v3 }
 0x205   : > { %1483 = vmatpush3.bf16.msra.mxu1 %v1655_v3 }
 0x206   : > { %1484 = vmatprep.subr.bf16.mxu1 %v1656_v4 }
 0x209   : > { %1485 = vmatpush3.bf16.msra.mxu1 %v1656_v4 }
 0x20a   : > { %1486 = vmatprep.subr.bf16.mxu1 %v1657_v5 }
 0x20d   : > { %1487 = vmatpush3.bf16.msra.mxu1 %v1657_v5 }
 0x20e   : > { %1488 = vmatprep.subr.bf16.mxu1 %v1658_v6 }
 0x211   : > { %1489 = vmatpush3.bf16.msra.mxu1 %v1658_v6 }
 0x212   : > { %1490 = vmatprep.subr.bf16.mxu1 %v1659_v7 }
 0x215   : > { %1491 = vmatpush3.bf16.msra.mxu1 %v1659_v7 }
 0x218   : > { %1493 = vmatmul.mubr.bf16.vlgmr.msra.gmra.mrb[0].mxu1 %v816_v41 }
 0x219   : > { %1496 = vmatprep.mubr.bf16.mxu1 %v817_v52 }
 0x220   : > { %1497 = vmatmul.mubr.bf16.gmra.mrb[4].mxu1 %v818_v51 }
 0x2eb   : > { %v1494_v8 = vpop.f32.mrb[0].mxu1 }
 0x2ec   : > { %1083 = vst [vmem:[%s397_s29 + $0x10] sm:$0xff] %v1494_v8  ;;  %v1050_v9 = vpop.f32.mrb[1].mxu1 }
 0x2ed   : > { %1081 = vst [vmem:[%s397_s29] sm:$0xff] %v1050_v9  ;;  %v1495_v10 = vpop.f32.mrb[2].mxu1 }
 0x2ee   : > { %1084 = vst [vmem:[%s397_s29 + $0x18] sm:$0xff] %v1495_v10  ;;  %v1053_v11 = vpop.f32.mrb[3].mxu1 }
 0x2ef   : > { %1082 = vst [vmem:[%s397_s29 + $0x8] sm:$0xff] %v1053_v11 }
 0x2f3   : > { %v1498_v12 = vpop.f32.mrb[4].mxu1 }
 0x2f4   : > { %1087 = vst [vmem:[%s397_s29 + $0x30] sm:$0xff] %v1498_v12  ;;  %v1066_v13 = vpop.f32.mrb[5].mxu1 }
 0x2f5   : > { %1085 = vst [vmem:[%s397_s29 + $0x20] sm:$0xff] %v1066_v13  ;;  %v1499_v14 = vpop.f32.mrb[6].mxu1 }
 0x2f6   : > { %1088 = vst [vmem:[%s397_s29 + $0x38] sm:$0xff] %v1499_v14  ;;  %v1069_v15 = vpop.f32.mrb[7].mxu1 }
 0x2f7   : > { %1086 = vst [vmem:[%s397_s29 + $0x28] sm:$0xff] %v1069_v15 }
 0x2f8   : > { %1845 = shalt.err (!%p1842_p6)
}
 0x2f9   : > { %s1846_s9 = scalar_lea.hbm %s2310_s18, 1024  ;;  %s1850_s11 = scalar_lea.hbm %s2364_s6, 8192 }
 0x2fa   : > { %p1847_p10 = scmp.ne.s32.totalorder %s2310_s18, %s1846_s9  ;;  %p1851_p2 = scmp.lt.u32.totalorder %s2310_s18, %s2364_s6 }
 0x2fb   : > { %p1852_p12 = scmp.lt.u32.totalorder %s1850_s11, %s1846_s9  ;;  %p1854_p1 = scmp.lt.u32.totalorder %s1846_s9, %s2310_s18 }
 0x2fc   : > { %p1848_p9 = pnand %p1847_p10, %p2157_p5 }
 0x2fd   : > { %p1853_p4 = por %p1852_p12, %p1851_p2 }
 0x2fe   : > { %p1849_p13 = pneg %p1848_p9 }
 0x2ff   : > { %p1855_p8 = por %p1854_p1, %p1853_p4 }
 0x301   : > { %p1856_p0 = pnand %p1855_p8, %p1849_p13 }
 0x303   : > { %1859 = shalt.err (!%p1856_p0)
}
 0x304   : > { %s1941_s21 = smov 128   ;;  %s1942_s8 = smov 8  }
 0x305   : > { %1536 = dma.vmem_to_hbm [thread:$0]  (%p2157_p5), %s2305_s2, 1024, %s2310_s18, %s1090_s15, %s1941_s21, %s1941_s21, %s1942_s8  }
 0x306 PF: > { %s2404_s7 = sld [smem:[#allocation20_spill]]  ;;  %s2405_s27 = sld [smem:[#allocation21_spill]] }
 0x307   : > { %p1571_p3 = scmp.ge.s32.totalorder %s1930_s26, 2 }
 0x30c   : > { %s1120_s29 = sand.u32 1, %s2404_s7   ;;  %p2406_p7 = scmp.ne.s32.totalorder %s2405_s27, 0 }
 0x30d   : > { %s1121_s4 = scalar_lea.sflag [#allocation4], %s1120_s29 }
 0x30e   : > { %p1559_p11 = pnand %p1571_p3, %p2406_p7 }
 0x310   : > { %1905 = dma.done.wait (!%p1559_p11), %s1121_s4, 1024  }
 0x311   : > { %1907 = vsyncadd (!%p1559_p11), %s1121_s4, 4294966272  ;;  %s27_s26 = sadd.s32 1, %s1930_s26   ;;  %s2407_s21 = smov %s1914_s22 }
 0x312   : > { %p24_p6 = scmp.ge.s32.totalorder %s27_s26, 10   ;;  %s2408_s22 = smov %s1918_s23 }
 0x313   : > { %s2409_s23 = smov %s2168_s28  ;;  %s2410_s24 = smov %s1926_s25 }
 0x314   : > { %s2411_s25 = smov %s2413_s20  ;;  %26 = sbr.rel (!%p24_p6) target bundleno = 16 (0x10), region = 120 }
 0x31b   :  { %1126 = vsyncpa [#allocation3], 1 }
 0x31c   :  { %1128 = vsyncpa [#allocation3 + $0x1], 1 }
 0x31d   :  { %1129 = vsyncpa [#allocation6], 1 }
 0x31e   :  { %1131 = vsyncpa [#allocation6 + $0x1], 1 }
 0x31f   :  { %1132 = vsyncpa [#allocation9], 1 }
 0x320   :  { %1133 = vsyncpa [#allocation12], 1 }
 0x321   :  { %1134 = vsyncpa [#allocation4], 1 }
 0x322   :  { %1136 = vsyncpa [#allocation4 + $0x1], 1 }

</bundles_post_ra>
